<compile_context>
chip_gen: v7x
topology: tpu7x:2x2x1
jax: 0.10.0
libtpu: 0.0.40
codegen_flags: <defaults>
</compile_context>

<pallas_src>
import functools

import jax
import jax.numpy as jnp
from jax import lax
from jax.experimental import pallas as pl
from jax.experimental.pallas import tpu as pltpu

ALPHA = 0.25
GAMMA = 2.0

LANES = 128


def _round_up(x, m):
    return ((x + m - 1) // m) * m


def _focal_loss_kernel(x_ref, t_ref, out_ref, *, block_rows, tail_rows,
                       alpha, gamma, binary_targets):
    x = x_ref[...].astype(jnp.float32)
    t = t_ref[...].astype(jnp.float32)

    # Numerically-stable BCE-with-logits (matches torch's implementation):
    #   bce = max(x, 0) - x*t + log1p(exp(-|x|))
    m = jnp.maximum(x, 0.0)
    e = jnp.exp(-jnp.abs(x))            # EUP transcendental #1
    bce = m - x * t + jnp.log1p(e)      # EUP transcendental #2

    if binary_targets:
        # pt = exp(-bce) = exp(x*t - max(x,0)) / (1 + e).  For hard targets
        # t in {0, 1} the numerator is exactly 1 (sign of x agrees with t) or
        # e (disagrees), so the second exp becomes a select + one reciprocal.
        # NOTE: pl.reciprocal(1 + e, approx=True) (single-pass vrcp) would
        # buy a little extra EUP headroom at ~1e-3 relative error; the exact
        # divide is kept so the result matches the torch reference to f32
        # precision.
        mismatch = jnp.logical_xor(x > 0.0, t >= 0.5)
        num = jnp.where(mismatch, e, 1.0)
        pt = num / (1.0 + e)
    else:
        # Soft targets: keep the exact exp(-bce) path.
        pt = jnp.exp(-bce)

    one_minus_pt = 1.0 - pt

    # (1 - pt) ** gamma: unroll integer gamma as repeated multiplies (VALU)
    # instead of a float pow (which lowers to log+exp on the single EUP).
    if float(gamma).is_integer() and float(gamma) >= 0.0:
        g = int(gamma)
        if g == 0:
            mod = jnp.ones_like(one_minus_pt)
        else:
            mod = one_minus_pt
            for _ in range(g - 1):
                mod = mod * one_minus_pt
    else:
        mod = one_minus_pt ** gamma

    f_loss = alpha * mod * bce

    def _write(fl):
        # Per-lane partial sum for this block, broadcast across 8 sublanes so
        # the output block is a full, aligned (8,128) native tile (unmasked
        # stores).  The wrapper reads sublane 0 of each block.
        s = jnp.sum(fl, axis=0, keepdims=True)              # (1, LANES)
        out_ref[...] = jnp.broadcast_to(s, (8, LANES))

    if tail_rows == block_rows:
        # Every grid block is fully valid: pure streaming, no masking cost.
        _write(f_loss)
    else:
        # Only the FINAL grid block extends past the input; every in-bounds
        # row is fully lane-valid (the <128-element tail is handled in the
        # wrapper), so a per-row compare with a static bound suffices.
        is_last = pl.program_id(0) == pl.num_programs(0) - 1

        @pl.when(jnp.logical_not(is_last))
        def _():
            _write(f_loss)

        @pl.when(is_last)
        def _():
            row_ids = lax.broadcasted_iota(jnp.int32, (block_rows, LANES), 0)
            _write(jnp.where(row_ids < tail_rows, f_loss, 0.0))


def _focal_elems_f32(x, t, alpha, gamma):
    """Plain-jnp focal loss per element (used for the <128-elem tail)."""
    x = x.astype(jnp.float32)
    t = t.astype(jnp.float32)
    bce = jnp.maximum(x, 0.0) - x * t + jnp.log1p(jnp.exp(-jnp.abs(x)))
    pt = jnp.exp(-bce)
    return alpha * (1.0 - pt) ** gamma * bce


def focal_loss(inputs, targets, alpha=ALPHA, gamma=GAMMA, binary_targets=True):
    """Focal loss with logits=True, reduce=True. Returns a scalar (f32)."""
    assert inputs.shape == targets.shape
    total_elems = inputs.size

    flat_x = inputs.reshape(-1)
    flat_t = targets.reshape(-1)

    rows = total_elems // LANES
    tail_elems = total_elems - rows * LANES

    if rows == 0:
        # Fewer than 128 elements: a kernel launch is not worth it.
        return (jnp.sum(_focal_elems_f32(flat_x, flat_t, alpha, gamma))
                / jnp.float32(total_elems))

    # Lane-dense (rows, 128) bulk WITHOUT jnp.pad: for 128-divisible sizes
    # this is a free reshape; for ragged sizes only a prefix slice is taken
    # and the <=127-element tail is folded in with plain jnp below.
    if tail_elems:
        bulk_x = flat_x[: rows * LANES]
        bulk_t = flat_t[: rows * LANES]
    else:
        bulk_x, bulk_t = flat_x, flat_t
    x2d = bulk_x.reshape(rows, LANES)
    t2d = bulk_t.reshape(rows, LANES)

    # Dtype-aware block size: ~2 MiB of NATIVE bytes per input block, capped
    # so the in-kernel f32 footprint per block stays <= 2 MiB (4096 rows).
    # Budget (double-buffered inputs + full-block f32 temporaries) fits the
    # scoped-VMEM defaults of v5e (16 MiB w/ explicit raise), v6e (32 MiB)
    # and v7x (32 of 64 MiB physical).
    itemsize = x2d.dtype.itemsize
    max_block_rows = max(8, min((2 * 1024 * 1024) // (LANES * itemsize), 4096))

    # At least 2 (and preferably an even number of) blocks so the "parallel"
    # grid axis can be sharded across both v7x TensorCores; blocks stay
    # sublane-aligned (multiple of 8 rows).
    num_blocks = pl.cdiv(rows, max_block_rows)
    if num_blocks < 2:
        num_blocks = 2
    elif num_blocks % 2:
        num_blocks += 1
    block_rows = max(8, _round_up(pl.cdiv(rows, num_blocks), 8))
    num_blocks = pl.cdiv(rows, block_rows)
    tail_rows = rows - (num_blocks - 1) * block_rows  # valid rows, last block

    kernel = functools.partial(
        _focal_loss_kernel,
        block_rows=block_rows,
        tail_rows=tail_rows,
        alpha=float(alpha),
        gamma=float(gamma),
        binary_targets=bool(binary_targets),
    )

    n_bulk = rows * LANES
    cost = pl.CostEstimate(
        flops=16 * n_bulk,
        transcendentals=2 * n_bulk,
        bytes_accessed=2 * n_bulk * itemsize + num_blocks * 8 * LANES * 4,
    )

    partials = pl.pallas_call(
        kernel,
        out_shape=jax.ShapeDtypeStruct((num_blocks * 8, LANES), jnp.float32),
        grid_spec=pltpu.PrefetchScalarGridSpec(
            num_scalar_prefetch=0,
            grid=(num_blocks,),
            in_specs=[
                pl.BlockSpec((block_rows, LANES), lambda i: (i, 0)),
                pl.BlockSpec((block_rows, LANES), lambda i: (i, 0)),
            ],
            out_specs=pl.BlockSpec((8, LANES), lambda i: (i, 0)),
        ),
        compiler_params=pltpu.CompilerParams(
            dimension_semantics=("parallel",),
            vmem_limit_bytes=32 * 1024 * 1024,
        ),
        cost_estimate=cost,
    )(x2d, t2d)

    # Each block wrote its (1,128) per-lane partial sum replicated across 8
    # sublanes; take sublane 0 of each block and finish the tiny reduce here.
    total_sum = jnp.sum(partials.reshape(num_blocks, 8, LANES)[:, 0, :])

    if tail_elems:
        tail_x = flat_x[rows * LANES:]
        tail_t = flat_t[rows * LANES:]
        total_sum = total_sum + jnp.sum(
            _focal_elems_f32(tail_x, tail_t, alpha, gamma))

    # NOTE: accumulation is plain f32; for extremely large element counts the
    # mean may differ from torch's reduction order by a few ulps.
    return total_sum / jnp.float32(total_elems)


def focal_loss_ref(inputs, targets, alpha=ALPHA, gamma=GAMMA):
    x = inputs.astype(jnp.float32)
    t = targets.astype(jnp.float32)
    bce = jnp.maximum(x, 0.0) - x * t + jnp.log1p(jnp.exp(-jnp.abs(x)))
    pt = jnp.exp(-bce)
    return jnp.mean(alpha * (1.0 - pt) ** gamma * bce)


if __name__ == "__main__":
    key = jax.random.PRNGKey(0)
    k1, k2 = jax.random.split(key)

    # NCHW logits and binary targets.
    shape = (2, 4, 16, 16)
    inputs = jax.random.normal(k1, shape, dtype=jnp.float32) * 2.0
    targets = jax.random.bernoulli(k2, 0.3, shape).astype(jnp.float32)

    loss = jax.block_until_ready(focal_loss(inputs, targets))
    ref = jax.block_until_ready(focal_loss_ref(inputs, targets))

    assert jnp.allclose(loss, ref, rtol=1e-5, atol=1e-6), (loss, ref)
    print("KERNEL_OK")
</pallas_src>

<mosaic_0001>
module attributes {stable_mosaic.version = 11 : i64} {
  func.func @_focal_loss_kernel(%arg0: i32, %arg1: memref<8x128xf32, #tpu.memory_space<vmem>>, %arg2: memref<8x128xf32, #tpu.memory_space<vmem>>, %arg3: memref<8x128xf32, #tpu.memory_space<vmem>>) attributes {dimension_semantics = [#tpu.dimension_semantics<parallel>], iteration_bounds = array<i64: 2>, scalar_prefetch = 0 : i64, scratch_operands = 0 : i64, tpu.core_type = #tpu.core_type<tc>, window_params = [{transform_indices = @transform_0, window_bounds = array<i64: 8, 128>}, {transform_indices = @transform_1, window_bounds = array<i64: 8, 128>}, {transform_indices = @transform_2, window_bounds = array<i64: 8, 128>}]} {
    %c0 = arith.constant 0 : index
    %c0_0 = arith.constant 0 : index
    %0 = vector.load %arg1[%c0, %c0_0] : memref<8x128xf32, #tpu.memory_space<vmem>>, vector<8x128xf32>
    %c0_1 = arith.constant 0 : index
    %c0_2 = arith.constant 0 : index
    %1 = vector.load %arg2[%c0_1, %c0_2] : memref<8x128xf32, #tpu.memory_space<vmem>>, vector<8x128xf32>
    %cst = arith.constant 0.000000e+00 : f32
    %2 = vector.broadcast %cst : f32 to vector<8x128xf32>
    %3 = arith.maximumf %0, %2 : vector<8x128xf32>
    %4 = math.absf %0 : vector<8x128xf32>
    %cst_3 = arith.constant 0.000000e+00 : f32
    %5 = vector.broadcast %cst_3 : f32 to vector<8x128xf32>
    %6 = arith.subf %5, %4 : vector<8x128xf32>
    %7 = math.exp %6 : vector<8x128xf32>
    %8 = arith.mulf %0, %1 : vector<8x128xf32>
    %9 = arith.subf %3, %8 : vector<8x128xf32>
    %10 = math.log1p %7 : vector<8x128xf32>
    %11 = arith.addf %9, %10 : vector<8x128xf32>
    %cst_4 = arith.constant 0.000000e+00 : f32
    %12 = vector.broadcast %cst_4 : f32 to vector<8x128xf32>
    %13 = arith.cmpf ogt, %0, %12 : vector<8x128xf32>
    %cst_5 = arith.constant 5.000000e-01 : f32
    %14 = vector.broadcast %cst_5 : f32 to vector<8x128xf32>
    %15 = arith.cmpf oge, %1, %14 : vector<8x128xf32>
    %16 = arith.xori %13, %15 : vector<8x128xi1>
    %cst_6 = arith.constant 1.000000e+00 : f32
    %17 = vector.broadcast %cst_6 : f32 to vector<8x128xf32>
    %18 = arith.select %16, %7, %17 : vector<8x128xi1>, vector<8x128xf32>
    %cst_7 = arith.constant 1.000000e+00 : f32
    %19 = vector.broadcast %cst_7 : f32 to vector<8x128xf32>
    %20 = arith.addf %19, %7 : vector<8x128xf32>
    %21 = arith.divf %18, %20 : vector<8x128xf32>
    %cst_8 = arith.constant 1.000000e+00 : f32
    %22 = vector.broadcast %cst_8 : f32 to vector<8x128xf32>
    %23 = arith.subf %22, %21 : vector<8x128xf32>
    %24 = arith.mulf %23, %23 : vector<8x128xf32>
    %cst_9 = arith.constant 2.500000e-01 : f32
    %25 = vector.broadcast %cst_9 : f32 to vector<8x128xf32>
    %26 = arith.mulf %25, %24 : vector<8x128xf32>
    %27 = arith.mulf %26, %11 : vector<8x128xf32>
    %cst_10 = arith.constant dense<0.000000e+00> : vector<128xf32>
    %28 = vector.multi_reduction <add>, %27, %cst_10 [0] : vector<8x128xf32> to vector<128xf32>
    %29 = vector.shape_cast %28 : vector<128xf32> to vector<1x128xf32>
    %30 = vector.shape_cast %29 : vector<1x128xf32> to vector<1x128xf32>
    %31 = vector.broadcast %30 : vector<1x128xf32> to vector<8x128xf32>
    %c0_11 = arith.constant 0 : index
    %c0_12 = arith.constant 0 : index
    %32 = vector.load %arg3[%c0_11, %c0_12] : memref<8x128xf32, #tpu.memory_space<vmem>>, vector<8x128xf32>
    tpu.vector_store %arg3[%c0_11, %c0_12], %31 {strides = array<i32>} : memref<8x128xf32, #tpu.memory_space<vmem>>, vector<8x128xf32>,
    return
  }
  func.func @transform_0(%arg0: i32) -> (i32, i32) {
    %c0_i32 = arith.constant 0 : i32
    %c0_i32_0 = arith.constant 0 : i32
    return %arg0, %c0_i32 : i32, i32
  }
  func.func @transform_1(%arg0: i32) -> (i32, i32) {
    %c0_i32 = arith.constant 0 : i32
    %c0_i32_0 = arith.constant 0 : i32
    return %arg0, %c0_i32 : i32, i32
  }
  func.func @transform_2(%arg0: i32) -> (i32, i32) {
    %c0_i32 = arith.constant 0 : i32
    %c0_i32_0 = arith.constant 0 : i32
    return %arg0, %c0_i32 : i32, i32
  }
}

</mosaic_0001>

<bundles_post_ra>
// kernel: tpu_custom_call.1
= control target key start
LH: loop header
LB: loop body
LE: loop exit
PB: predicated region body
PF: predicated region fallthrough
CT: control target
= control target key end

     0   :  { %7 = vsyncpa [#allocation3], 0  ;;  %s776_s0 = inlined_call_operand.hbm [shape: f32[16,128], index: 0, kind: input, shape index: {}]   ;;  %s777_s1 = inlined_call_operand.hbm [shape: f32[16,128], index: 1, kind: input, shape index: {}]   ;;  %s778_s2 = inlined_call_operand.hbm [shape: f32[16,128], index: 2, kind: output, shape index: {}]  }
   0x1   :  { %9 = vsyncpa [#allocation3 + $0x1], 0 }
   0x2   :  { %10 = vsyncpa [#allocation6], 0 }
   0x3   :  { %12 = vsyncpa [#allocation6 + $0x1], 0 }
   0x4   :  { %13 = vsyncpa [#allocation4], 0 }
   0x5   :  { %15 = vsyncpa [#allocation4 + $0x1], 0  ;;  %s562_s9 = smov 0   ;;  %s564_s10 = smov 0  }
   0x6   :  { %s566_s11 = smov 0   ;;  %s568_s12 = smov 0  }
   0x7 LB: > { %s583_s13 = sadd.s32 4294967295, %s542_s12   ;;  %s340_s14 = sadd.s32 4294967294, %s542_s12   ;;  %s542_s12 = sphi %s568_s12, %s797_s12   ;;  %s538_s11 = sphi %s566_s11, %s796_s11   ;;  %s534_s10 = sphi %s564_s10, %s795_s10   ;;  %s530_s9 = sphi %s562_s9, %s794_s9  }
   0x8   : > { %s587_s15 = sadd.s32 1, %s542_s12   ;;  %s28_s16 = sadd.s32 1, %s538_s11 }
   0x9   : > { %s25_s17 = ssub.s32 %s542_s12, %s587_s15  ;;  %p35_p0 = scmp.ne.s32.totalorder %s538_s11, %s534_s10 }
   0xa   : > { %p26_p1 = scmp.eq.s32.totalorder %s25_s17, 0  ;;  %p36_p2 = scmp.eq.s32.totalorder %s542_s12, 0 }
   0xb   : > { %p41_p3 = scmp.ne.s32.totalorder %s534_s10, %s530_s9  ;;  %p42_p4 = scmp.eq.s32.totalorder %s583_s13, 0 }
   0xc   : > { %s599_s18 = scalar_select %p26_p1, %s538_s11, %s28_s16  }
   0xd   : > { %p601_p5 = por %p36_p2, %p35_p0  ;;  %p605_p6 = por %p42_p4, %p41_p3 }
   0xe   : > { %p91_p7 = scmp.eq.s32.totalorder %s583_s13, 1  ;;  %p97_p8 = scmp.eq.s32.totalorder %s340_s14, 1 }
   0xf   : > { %s782_s20 = scalar_select %p605_p6, 1, 0 }
  0x10   : > { %p372_p10 = scmp.lt.s32.totalorder %s542_s12, 2  ;;  %p612_p11 = por %p91_p7, %p35_p0 }
  0x11   : > { %p616_p12 = por %p97_p8, %p41_p3  ;;  %s621_s23 = sand.u32 1, %s538_s11  }
  0x12   : > { %s783_s21 = scalar_select %p612_p11, 1, 0 }
  0x13   : > { %s784_s22 = scalar_select %p616_p12, 1, 0 }
  0x14   : > { %s344_s24 = sshll.u32 %s542_s12, 7  ;;  %s343_s25 = sshll.u32 %s621_s23, 3 }
  0x15   : > { %s630_s28 = scalar_lea.hbm %s776_s0, %s344_s24  ;;  %s121_s29 = scalar_lea.vmem [#allocation2], %s343_s25 }
  0x16   : > { %s128_s30 = sshll.u32 %s121_s29, 4  ;;  %p636_p13 = pnand %p372_p10, %p601_p5  ;;  %s640_s30 = int_to_ptr.vmem [resolvable:$true] %s128_s30 }
  0x17   : > { %s118_s4 = scalar_lea.sflag [#allocation3], %s621_s23  ;;  %s412_s5 = scalar_lea.hbm %s630_s28, 128 }
  0x18   : > { %p413_p2 = scmp.ne.s32.totalorder %s630_s28, %s412_s5  ;;  %p414_p3 = pneg %p636_p13 }
  0x19   : > { %s417_s8 = scalar_lea.hbm %s776_s0, 256  ;;  %p418_p5 = scmp.lt.u32.totalorder %s630_s28, %s776_s0 }
  0x1a   : > { %p415_p4 = pnand %p414_p3, %p413_p2  ;;  %p419_p8 = scmp.lt.u32.totalorder %s417_s8, %s412_s5 }
  0x1b   : > { %p421_p9 = scmp.lt.u32.totalorder %s412_s5, %s630_s28 }
  0x1c   : > { %p416_p7 = pneg %p415_p4  ;;  %p420_p10 = por %p419_p8, %p418_p5 }
  0x1e   : > { %p422_p0 = por %p421_p9, %p420_p10 }
  0x20   : > { %p423_p1 = pnand %p422_p0, %p416_p7 }
  0x22   : > { %426 = shalt.err (!%p423_p1)
}
  0x23   : > { %s427_s17 = scalar_lea.vmem %s640_s30, 128  ;;  %s544_s19 = smov [#allocation2]  }
  0x24   : > { %p428_p2 = scmp.ne.s32.totalorder %s640_s30, %s427_s17  ;;  %s432_s26 = sshll.u32 %s544_s19, 4  ;;  %s433_s26 = int_to_ptr.vmem [resolvable:$false] %s432_s26 }
  0x25   : > { %s434_s27 = scalar_lea.vmem %s433_s26, 256  ;;  %p435_p11 = scmp.lt.s32.totalorder %s640_s30, %s433_s26 }
  0x26   : > { %p430_p4 = pnand %p428_p2, %p414_p3  ;;  %p436_p5 = scmp.lt.s32.totalorder %s434_s27, %s427_s17 }
  0x28   : > { %p431_p12 = pneg %p430_p4  ;;  %p437_p8 = por %p436_p5, %p435_p11 }
  0x2a   : > { %p438_p9 = pnand %p437_p8, %p431_p12 }
  0x2c   : > { %441 = shalt.err (!%p438_p9)
}
  0x2d   : > { %364 = dma.hbm_to_vmem [thread:$0]  (!%p636_p13), %s630_s28, 128, %s640_s30, %s118_s4  }
  0x2e   : > { %p786_p0 = scmp.lt.s32.totalorder %s542_s12, 3  ;;  %p787_p1 = scmp.ge.s32.totalorder %s542_s12, 1 }
  0x2f   : > { %s683_s7 = scalar_lea.hbm %s777_s1, %s344_s24  ;;  %s139_s8 = scalar_lea.vmem [#allocation5], %s343_s25 }
  0x30   : > { %p674_p7 = pnand %p787_p1, %p786_p0  ;;  %s146_s14 = sshll.u32 %s139_s8, 4  ;;  %s147_s14 = int_to_ptr.vmem [resolvable:$true] %s146_s14 }
  0x31   : > { %s136_s28 = scalar_lea.sflag [#allocation6], %s621_s23  ;;  %s442_s30 = scalar_lea.hbm %s683_s7, 128 }
  0x32   : > { %s788_s29 = scalar_select %p674_p7, 1, 0 }
  0x33   : > { %p443_p11 = scmp.ne.s32.totalorder %s683_s7, %s442_s30  ;;  %s447_s24 = scalar_lea.hbm %s777_s1, 256 }
  0x34   : > { %p448_p2 = scmp.lt.u32.totalorder %s683_s7, %s777_s1  ;;  %p449_p4 = scmp.lt.u32.totalorder %s447_s24, %s442_s30 }
  0x35   : > { %p445_p12 = pnand %p443_p11, %p414_p3  ;;  %p451_p8 = scmp.lt.u32.totalorder %s442_s30, %s683_s7 }
  0x36   : > { %p450_p5 = por %p449_p4, %p448_p2 }
  0x37   : > { %p446_p10 = pneg %p445_p12 }
  0x38   : > { %p452_p9 = por %p451_p8, %p450_p5 }
  0x3a   : > { %p453_p0 = pnand %p452_p9, %p446_p10 }
  0x3c   : > { %456 = shalt.err (!%p453_p0)
}
  0x3d   : > { %s457_s23 = scalar_lea.vmem %s147_s14, 128  ;;  %s545_s25 = smov [#allocation5]  }
  0x3e   : > { %p458_p1 = scmp.ne.s32.totalorder %s147_s14, %s457_s23  ;;  %s462_s26 = sshll.u32 %s545_s25, 4  ;;  %s463_s26 = int_to_ptr.vmem [resolvable:$false] %s462_s26 }
  0x3f   : > { %s464_s27 = scalar_lea.vmem %s463_s26, 256  ;;  %p465_p6 = scmp.lt.s32.totalorder %s147_s14, %s463_s26 }
  0x40   : > { %p460_p11 = pnand %p458_p1, %p414_p3  ;;  %p466_p7 = scmp.lt.s32.totalorder %s464_s27, %s457_s23 }
  0x42   : > { %p461_p12 = pneg %p460_p11  ;;  %p467_p2 = por %p466_p7, %p465_p6 }
  0x44   : > { %p468_p4 = pnand %p467_p2, %p461_p12 }
  0x46   : > { %471 = shalt.err (!%p468_p4)
}
  0x47   : > { %367 = dma.hbm_to_vmem [thread:$0]  (!%p636_p13), %s683_s7, 128, %s147_s14, %s136_s28  }
  0x48   : > { %p789_p10 = scmp.ne.s32.totalorder %s788_s29, 0 }
  0x49   : > { %s710_s5 = sand.u32 (!%p789_p10), 1, %s534_s10   ;;  %p790_p6 = scmp.ne.s32.totalorder (!%p789_p10), %s782_s20, 0 }
  0x4a   : > { %155 = sbr.rel (%p789_p10) target bundleno = 152 (0x98), region = 28  ;;  %s713_s6 = sshll.u32 (!%p789_p10), %s710_s5, 3 }
  0x4b   : > { %s158_s8 = scalar_lea.sflag (!%p789_p10), [#allocation3], %s710_s5  ;;  %s161_s30 = scalar_lea.vmem (!%p789_p10), [#allocation2], %s713_s6 }
  0x51   : > { %517 = dma.done.wait (%p790_p6), %s158_s8, 128  }
  0x52   : > { %519 = vsyncadd (%p790_p6), %s158_s8, 4294967168  ;;  %s167_s3 = scalar_lea.sflag [#allocation6], %s710_s5  ;;  %s170_s29 = scalar_lea.vmem [#allocation5], %s713_s6 }
  0x53   : > { %521 = dma.done.wait (%p790_p6), %s167_s3, 128  }
  0x54   : > { %523 = vsyncadd (%p790_p6), %s167_s3, 4294967168  ;;  %v196_v0 = vld [vmem:[%s161_s30] sm:$0xff]  ;;  %v197_v6 = vld [vmem:[%s170_s29] sm:$0xff]  ;;  %s195_s20 = scalar_lea.vmem [#allocation7], %s713_s6  ;;  %s352_s14 = sshll.u32 %s583_s13, 7 }
  0x55   : > { %v199_v1 = vand.u32 2147483647, %v196_v0  ;;  %vm215_vm0 = vcmp.gt.f32.partialorder %v196_v0, 0.0  ;;  %vm216_vm1 = vcmp.ge.f32.partialorder %v197_v6, 0.5  ;;  %v198_v10 = vmax.f32 %v196_v0, 0.0  ;;  %s247_s7 = sshll.u32 %s195_s20, 4  ;;  %s734_s16 = scalar_lea.hbm %s778_s2, %s352_s14  ;;  %s729_s7 = int_to_ptr.vmem [resolvable:$true] %s247_s7 }
  0x56   : > { %vm217_vm2 = vmxor %vm215_vm0, %vm216_vm1  ;;  %v203_v11 = vmul.f32 %v197_v6, %v196_v0  ;;  %s234_s24 = scalar_lea.sflag [#allocation4], %s710_s5  ;;  %s472_s17 = scalar_lea.vmem %s729_s7, 128 }
  0x57   : > { %v200_v2 = vsub.f32 0.0, %v199_v1  ;;  %p473_p13 = scmp.ne.s32.totalorder %s729_s7, %s472_s17  ;;  %p791_p3 = scmp.ne.s32.totalorder %s783_s21, 0 }
  0x58   : > { %v204_v17 = vsub.f32 %v198_v10, %v203_v11  ;;  %s546_s13 = smov [#allocation7]  }
  0x59   : > { %v201_v3 = vmul.f32 1.442695, %v200_v2  ;;  %p474_p7 = pnand %p473_p13, %p791_p3  ;;  %s476_s19 = sshll.u32 %s546_s13, 4  ;;  %s477_s19 = int_to_ptr.vmem [resolvable:$false] %s476_s19 }
  0x5a   : > { %s478_s23 = scalar_lea.vmem %s477_s19, 256  ;;  %p479_p8 = scmp.lt.s32.totalorder %s729_s7, %s477_s19 }
  0x5b   : > { %406 = vpow2.f32 %v201_v3  ;;  %p475_p5 = pneg %p474_p7  ;;  %p480_p9 = scmp.lt.s32.totalorder %s478_s23, %s472_s17 }
  0x5d   : > { %p481_p0 = por %p480_p9, %p479_p8 }
  0x5f   : > { %p482_p1 = pnand %p481_p0, %p475_p5 }
  0x65   : > { %v407_v4 = vpop.eup %406 }
  0x66   : > { %v205_v5 = vadd.f32 1.0, %v407_v4  ;;  %v208_v7 = vmul.f32 -0.5, %v407_v4  ;;  %v211_v9 = vand.u32 2147483647, %v407_v4  ;;  %v218_v13 = vsel %vm217_vm2, %v407_v4, 1.0 }
  0x68   : > { %408 = vlog2.f32 %v205_v5  ;;  %v209_v8 = vadd.f32 1.0, %v208_v7  ;;  %vm212_vm3 = vcmp.lt.f32.partialorder %v211_v9, 0.0004427343 }
  0x69   : > { %410 = vrcp.f32 %v205_v5 }
  0x6a   : > { %v210_v12 = vmul.f32 %v407_v4, %v209_v8 }
  0x72   : > { %v409_v14 = vpop.eup %408 }
  0x73   : > { %v411_v15 = vpop.eup %410  ;;  %v207_v16 = vmul.f32 0.6931472, %v409_v14 }
  0x74   : > { %v221_v18 = vmul.f32 %v411_v15, %v218_v13 }
  0x75   : > { %v213_v19 = vsel %vm212_vm3, %v210_v12, %v207_v16 }
  0x76   : > { %v222_v20 = vsub.f32 1.0, %v221_v18  ;;  %v214_v21 = vadd.f32 %v213_v19, %v204_v17 }
  0x78   : > { %v223_v22 = vmul.f32 %v222_v20, %v222_v20 }
  0x7a   : > { %v224_v23 = vmul.f32 0.25, %v223_v22 }
  0x7c   : > { %v225_v24 = vmul.f32 %v224_v23, %v214_v21 }
  0x7e   : > { %v226_v25 = vrot.slane %v225_v24, 4 }
  0x80   : > { %v227_v26 = vadd.f32 %v226_v25, %v225_v24 }
  0x82   : > { %v228_v27 = vrot.slane %v227_v26, 2 }
  0x84   : > { %v229_v28 = vadd.f32 %v228_v27, %v227_v26 }
  0x86   : > { %v230_v29 = vrot.slane %v229_v28, 1 }
  0x88   : > { %v231_v30 = vadd.f32 %v230_v29, %v229_v28 }
  0x8a   : > { %232 = vst [vmem:[%s195_s20] sm:$0xff] %v231_v30 }
  0x8b   : > { %485 = shalt.err (!%p482_p1)
}
  0x8c   : > { %s486_s25 = scalar_lea.hbm %s734_s16, 128  ;;  %s490_s5 = scalar_lea.hbm %s778_s2, 256 }
  0x8d   : > { %p487_p11 = scmp.ne.s32.totalorder %s734_s16, %s486_s25  ;;  %p491_p4 = scmp.lt.u32.totalorder %s734_s16, %s778_s2 }
  0x8e   : > { %p492_p10 = scmp.lt.u32.totalorder %s490_s5, %s486_s25  ;;  %p494_p13 = scmp.lt.u32.totalorder %s486_s25, %s734_s16 }
  0x8f   : > { %p488_p12 = pnand %p487_p11, %p791_p3 }
  0x90   : > { %p493_p6 = por %p492_p10, %p491_p4 }
  0x91   : > { %p489_p2 = pneg %p488_p12 }
  0x92   : > { %p495_p7 = por %p494_p13, %p493_p6 }
  0x94   : > { %p496_p5 = pnand %p495_p7, %p489_p2 }
  0x96   : > { %499 = shalt.err (!%p496_p5)
}
  0x97   : > { %359 = dma.vmem_to_hbm [thread:$0]  (%p791_p3), %s729_s7, 128, %s734_s16, %s234_s24  }
  0x98 PF: > { %s259_s30 = sand.u32 1, %s530_s9   ;;  %p792_p8 = scmp.ne.s32.totalorder %s784_s22, 0 }
  0x99   : > { %p793_p9 = scmp.ge.s32.totalorder %s542_s12, 2  ;;  %s260_s3 = scalar_lea.sflag [#allocation4], %s259_s30 }
  0x9b   : > { %p369_p0 = pnand %p793_p9, %p792_p8 }
  0x9d   : > { %525 = dma.done.wait (!%p369_p0), %s260_s3, 128  }
  0x9e   : > { %527 = vsyncadd (!%p369_p0), %s260_s3, 4294967168  ;;  %p18_p1 = scmp.ge.s32.totalorder %s587_s15, 4   ;;  %s794_s9 = smov %s534_s10 }
  0x9f   : > { %s795_s10 = smov %s538_s11  ;;  %s796_s11 = smov %s599_s18 }
  0xa0   : > { %s797_s12 = smov %s587_s15  ;;  %20 = sbr.rel (!%p18_p1) target bundleno = 7 (0x7), region = 86 }
  0xa7   :  { %265 = vsyncpa [#allocation3], 1 }
  0xa8   :  { %267 = vsyncpa [#allocation3 + $0x1], 1 }
  0xa9   :  { %268 = vsyncpa [#allocation6], 1 }
  0xaa   :  { %270 = vsyncpa [#allocation6 + $0x1], 1 }
  0xab   :  { %271 = vsyncpa [#allocation4], 1 }
  0xac   :  { %273 = vsyncpa [#allocation4 + $0x1], 1 }

</bundles_post_ra>
